<compile_context>
chip_gen: v6e
topology: v6e:2x2x1
jax: 0.10.0
libtpu: 0.0.40
codegen_flags: <defaults>
</compile_context>

<pallas_src>
import jax
import jax.numpy as jnp
from jax import lax
from jax.experimental import pallas as pl
from jax.experimental.pallas import tpu as pltpu


def _mel_mse_kernel(olens_ref, before_ref, after_ref, ys_ref, out_ref, acc_ref):
    b = pl.program_id(0)
    t = pl.program_id(1)
    n_t = pl.num_programs(1)
    tile_l, d = ys_ref.shape

    # ---- per-b init: zero the VMEM partial-sum tile (no grid-carried scalar) --
    @pl.when(t == 0)
    def _():
        acc_ref[...] = jnp.zeros_like(acc_ref)

    # ---- streamed (tile_l, odim) slice of batch row b -------------------------
    olen_b = olens_ref[b]                                            # scalar int32 (SMEM)
    frame_idx = t * tile_l + lax.broadcasted_iota(jnp.int32, (tile_l, d), 0)

    ys = ys_ref[...].astype(jnp.float32)
    diff_b = before_ref[...].astype(jnp.float32) - ys
    diff_a = after_ref[...].astype(jnp.float32) - ys
    sq = diff_b * diff_b + diff_a * diff_a
    # select (not multiply-mask): NaN/Inf-safe for the unspecified contents of a
    # ragged last block, which is what makes dropping the padded copies legal.
    acc_ref[...] += jnp.where(frame_idx < olen_b, sq, 0.0)

    # ---- per-b finalize: one cross-lane reduce, one lane-dense block write ----
    @pl.when(t == n_t - 1)
    def _():
        out_ref[...] = jnp.full(out_ref.shape, jnp.sum(acc_ref[...]),
                                dtype=jnp.float32)


def fastspeech_loss(after_outs, before_outs, d_outs, ys, ds, ilens, olens,
                    *, tile_l=None):
    """Pallas wrapper. Returns (mel_loss, duration_loss) as float32 scalars.

    Mel tensors may be float32 or bfloat16; accumulation is always float32.
    (Feeding bf16 halves the dominant HBM traffic of this bandwidth-bound loss.)
    """
    B, Lmax, D = ys.shape
    itemsize = int(jnp.dtype(ys.dtype).itemsize)

    # Row-tile size: big enough to amortize per-step overhead, small enough for
    # double-buffering inside every generation's scoped-VMEM limit.
    # v7x users chasing the last few percent can pass tile_l=8192 explicitly.
    if tile_l is None:
        tile_l = 4096 if itemsize >= 4 else 8192
    tile_l = int(tile_l)
    if tile_l >= Lmax:
        tile_l = Lmax                      # single full-extent block (always legal)
    else:
        tile_l = max(8, (tile_l // 8) * 8)  # sublane rule for partial blocks
    n_t = pl.cdiv(Lmax, tile_l)

    olens_i32 = olens.astype(jnp.int32).reshape(B)          # -> SMEM scalars

    mel_spec = pl.BlockSpec((None, tile_l, D), lambda b, t: (b, t, 0))

    cost = pl.CostEstimate(
        flops=6 * B * Lmax * D,
        transcendentals=0,
        bytes_accessed=3 * B * Lmax * D * itemsize + B * 8 * 128 * 4 + B * 4,
    )

    partials = pl.pallas_call(
        _mel_mse_kernel,
        grid=(B, n_t),
        in_specs=[
            pl.BlockSpec(memory_space=pltpu.SMEM),           # olens (SMEM scalars)
            mel_spec,                                        # before_outs
            mel_spec,                                        # after_outs
            mel_spec,                                        # ys
        ],
        out_specs=pl.BlockSpec((None, 8, 128), lambda b, t: (b, 0, 0)),
        out_shape=jax.ShapeDtypeStruct((B, 8, 128), jnp.float32),
        scratch_shapes=[pltpu.VMEM((tile_l, D), jnp.float32)],   # per-b partial tile
        compiler_params=pltpu.CompilerParams(
            dimension_semantics=("parallel", "arbitrary"),
            vmem_limit_bytes=32 * 1024 * 1024),
        cost_estimate=cost,
    )(olens_i32, before_outs, after_outs, ys)

    # Final mean divisions (same degenerate NaN/Inf behavior as
    # masked_select + 'mean' when all lengths are zero).
    mel_sum = jnp.sum(partials[:, 0, 0])
    n_out = jnp.sum(olens_i32).astype(jnp.float32) * jnp.float32(D)
    mel_loss = mel_sum / n_out

    # Tiny duration L1 term: plain JAX in the wrapper (noise next to the mel
    # stream); keeps the kernel free of resident (B, Tmax) blocks.
    _, Tmax = d_outs.shape
    ilens_i32 = ilens.astype(jnp.int32).reshape(B)
    dur_mask = jnp.arange(Tmax, dtype=jnp.int32)[None, :] < ilens_i32[:, None]
    dur_err = jnp.abs(d_outs.astype(jnp.float32) - ds.astype(jnp.float32))
    dur_loss = (jnp.sum(jnp.where(dur_mask, dur_err, 0.0))
                / jnp.sum(ilens_i32).astype(jnp.float32))

    return mel_loss, dur_loss


def _reference(after_outs, before_outs, d_outs, ys, ds, ilens, olens):
    """Pure-JAX reference mirroring the PyTorch module (masking + 'mean')."""
    B, L, D = ys.shape
    _, T = d_outs.shape
    out_mask = (jnp.arange(L)[None, :] < olens[:, None]).astype(jnp.float32)[:, :, None]
    n_out = jnp.sum(out_mask) * D
    mel = jnp.sum((before_outs - ys) ** 2 * out_mask) / n_out
    mel = mel + jnp.sum((after_outs - ys) ** 2 * out_mask) / n_out
    dur_mask = (jnp.arange(T)[None, :] < ilens[:, None]).astype(jnp.float32)
    dur = jnp.sum(jnp.abs(d_outs - ds) * dur_mask) / jnp.sum(dur_mask)
    return mel, dur


if __name__ == "__main__":
    key = jax.random.PRNGKey(0)
    # Lmax=20 with tile_l=8 exercises the ragged (un-padded) last block and the
    # multi-tile per-b VMEM accumulation path.
    B, Lmax, odim, Tmax = 2, 20, 8, 8

    k1, k2, k3, k4, k5 = jax.random.split(key, 5)
    after_outs = jax.random.normal(k1, (B, Lmax, odim), dtype=jnp.float32)
    before_outs = jax.random.normal(k2, (B, Lmax, odim), dtype=jnp.float32)
    ys = jax.random.normal(k3, (B, Lmax, odim), dtype=jnp.float32)
    d_outs = jax.random.normal(k4, (B, Tmax), dtype=jnp.float32)
    ds = jnp.abs(jax.random.normal(k5, (B, Tmax), dtype=jnp.float32)) * 3.0
    ilens = jnp.array([Tmax, 5], dtype=jnp.int32)
    olens = jnp.array([Lmax, 13], dtype=jnp.int32)

    mel_loss, dur_loss = fastspeech_loss(after_outs, before_outs, d_outs, ys, ds,
                                         ilens, olens, tile_l=8)
    jax.block_until_ready((mel_loss, dur_loss))

    mel_ref, dur_ref = _reference(after_outs, before_outs, d_outs, ys, ds, ilens, olens)
    assert jnp.allclose(mel_loss, mel_ref, rtol=1e-5, atol=1e-5), (mel_loss, mel_ref)
    assert jnp.allclose(dur_loss, dur_ref, rtol=1e-5, atol=1e-5), (dur_loss, dur_ref)

    # Also exercise the default (large-tile, single-block) path.
    mel2, dur2 = fastspeech_loss(after_outs, before_outs, d_outs, ys, ds, ilens, olens)
    jax.block_until_ready((mel2, dur2))
    assert jnp.allclose(mel2, mel_ref, rtol=1e-5, atol=1e-5), (mel2, mel_ref)
    assert jnp.allclose(dur2, dur_ref, rtol=1e-5, atol=1e-5), (dur2, dur_ref)

    print("KERNEL_OK")
</pallas_src>

<mosaic_0001>
module attributes {stable_mosaic.version = 11 : i64} {
  func.func @_mel_mse_kernel(%arg0: i32, %arg1: i32, %arg2: memref<2xi32, #tpu.memory_space<smem>>, %arg3: memref<1x8x8xf32, #tpu.memory_space<vmem>>, %arg4: memref<1x8x8xf32, #tpu.memory_space<vmem>>, %arg5: memref<1x8x8xf32, #tpu.memory_space<vmem>>, %arg6: memref<1x8x128xf32, #tpu.memory_space<vmem>>, %arg7: memref<8x8xf32, #tpu.memory_space<vmem>>) attributes {dimension_semantics = [#tpu.dimension_semantics<parallel>, #tpu.dimension_semantics<arbitrary>], iteration_bounds = array<i64: 2, 3>, scalar_prefetch = 0 : i64, scratch_operands = 1 : i64, tpu.core_type = #tpu.core_type<tc>, window_params = [{transform_indices = @transform_0, window_bounds = array<i64: 2>}, {transform_indices = @transform_1, window_bounds = array<i64: 1, 8, 8>}, {transform_indices = @transform_2, window_bounds = array<i64: 1, 8, 8>}, {transform_indices = @transform_3, window_bounds = array<i64: 1, 8, 8>}, {transform_indices = @transform_4, window_bounds = array<i64: 1, 8, 128>}]} {
    %c0_i32 = arith.constant 0 : i32
    %0 = arith.cmpi eq, %arg1, %c0_i32 : i32
    %1 = arith.extui %0 : i1 to i32
    %c0_i32_0 = arith.constant 0 : i32
    %2 = arith.cmpi ne, %1, %c0_i32_0 : i32
    scf.if %2 {
      %cst_14 = arith.constant 0.000000e+00 : f32
      %30 = vector.broadcast %cst_14 : f32 to vector<8x8xf32>
      %c0_15 = arith.constant 0 : index
      %c0_16 = arith.constant 0 : index
      %31 = vector.load %arg7[%c0_15, %c0_16] : memref<8x8xf32, #tpu.memory_space<vmem>>, vector<8x8xf32>
      tpu.vector_store %arg7[%c0_15, %c0_16], %30 {strides = array<i32>} : memref<8x8xf32, #tpu.memory_space<vmem>>, vector<8x8xf32>,
    } else {
    }
    %3 = arith.index_cast %arg0 : i32 to index
    %4 = memref.load %arg2[%3] : memref<2xi32, #tpu.memory_space<smem>>
    %c8_i32 = arith.constant 8 : i32
    %5 = arith.muli %arg1, %c8_i32 : i32
    %6 = tpu.iota {dimensions = array<i32: 0>} : vector<8x8xi32>
    %7 = vector.broadcast %5 : i32 to vector<8x8xi32>
    %8 = arith.addi %7, %6 : vector<8x8xi32>
    %c0 = arith.constant 0 : index
    %c0_1 = arith.constant 0 : index
    %c0_2 = arith.constant 0 : index
    %9 = vector.load %arg5[%c0, %c0_1, %c0_2] : memref<1x8x8xf32, #tpu.memory_space<vmem>>, vector<1x8x8xf32>
    %10 = vector.shape_cast %9 : vector<1x8x8xf32> to vector<8x8xf32>
    %c0_3 = arith.constant 0 : index
    %c0_4 = arith.constant 0 : index
    %c0_5 = arith.constant 0 : index
    %11 = vector.load %arg3[%c0_3, %c0_4, %c0_5] : memref<1x8x8xf32, #tpu.memory_space<vmem>>, vector<1x8x8xf32>
    %12 = vector.shape_cast %11 : vector<1x8x8xf32> to vector<8x8xf32>
    %13 = arith.subf %12, %10 : vector<8x8xf32>
    %c0_6 = arith.constant 0 : index
    %c0_7 = arith.constant 0 : index
    %c0_8 = arith.constant 0 : index
    %14 = vector.load %arg4[%c0_6, %c0_7, %c0_8] : memref<1x8x8xf32, #tpu.memory_space<vmem>>, vector<1x8x8xf32>
    %15 = vector.shape_cast %14 : vector<1x8x8xf32> to vector<8x8xf32>
    %16 = arith.subf %15, %10 : vector<8x8xf32>
    %17 = arith.mulf %13, %13 : vector<8x8xf32>
    %18 = arith.mulf %16, %16 : vector<8x8xf32>
    %19 = arith.addf %17, %18 : vector<8x8xf32>
    %c0_9 = arith.constant 0 : index
    %c0_10 = arith.constant 0 : index
    %20 = vector.load %arg7[%c0_9, %c0_10] : memref<8x8xf32, #tpu.memory_space<vmem>>, vector<8x8xf32>
    %21 = vector.broadcast %4 : i32 to vector<8x8xi32>
    %22 = arith.cmpi slt, %8, %21 : vector<8x8xi32>
    %cst = arith.constant 0.000000e+00 : f32
    %23 = vector.broadcast %cst : f32 to vector<8x8xf32>
    %24 = arith.select %22, %19, %23 : vector<8x8xi1>, vector<8x8xf32>
    %25 = arith.addf %20, %24 : vector<8x8xf32>
    %c0_11 = arith.constant 0 : index
    %c0_12 = arith.constant 0 : index
    %26 = vector.load %arg7[%c0_11, %c0_12] : memref<8x8xf32, #tpu.memory_space<vmem>>, vector<8x8xf32>
    tpu.vector_store %arg7[%c0_11, %c0_12], %25 {strides = array<i32>} : memref<8x8xf32, #tpu.memory_space<vmem>>, vector<8x8xf32>,
    %c2_i32 = arith.constant 2 : i32
    %27 = arith.cmpi eq, %arg1, %c2_i32 : i32
    %28 = arith.extui %27 : i1 to i32
    %c0_i32_13 = arith.constant 0 : i32
    %29 = arith.cmpi ne, %28, %c0_i32_13 : i32
    scf.if %29 {
      %c0_14 = arith.constant 0 : index
      %c0_15 = arith.constant 0 : index
      %30 = vector.load %arg7[%c0_14, %c0_15] : memref<8x8xf32, #tpu.memory_space<vmem>>, vector<8x8xf32>
      %31 = vector.shape_cast %30 : vector<8x8xf32> to vector<1x8x8xf32>
      %cst_16 = arith.constant dense<0.000000e+00> : vector<1xf32>
      %32 = vector.multi_reduction <add>, %31, %cst_16 [1, 2] : vector<1x8x8xf32> to vector<1xf32>
      %33 = vector.shape_cast %32 : vector<1xf32> to vector<1x1x1xf32>
      %34 = vector.extract %33[0, 0, 0] : f32 from vector<1x1x1xf32>
      %35 = vector.broadcast %34 : f32 to vector<8x128xf32>
      %c0_17 = arith.constant 0 : index
      %c0_18 = arith.constant 0 : index
      %c0_19 = arith.constant 0 : index
      %36 = vector.load %arg6[%c0_17, %c0_18, %c0_19] : memref<1x8x128xf32, #tpu.memory_space<vmem>>, vector<1x8x128xf32>
      %37 = vector.shape_cast %36 : vector<1x8x128xf32> to vector<8x128xf32>
      %38 = vector.shape_cast %35 : vector<8x128xf32> to vector<1x8x128xf32>
      tpu.vector_store %arg6[%c0_17, %c0_18, %c0_19], %38 {strides = array<i32>} : memref<1x8x128xf32, #tpu.memory_space<vmem>>, vector<1x8x128xf32>,
    } else {
    }
    return
  }
  func.func @transform_0(%arg0: i32, %arg1: i32) -> i32 {
    %c0_i32 = arith.constant 0 : i32
    %c0_i32_0 = arith.constant 0 : i32
    return %c0_i32 : i32
  }
  func.func @transform_1(%arg0: i32, %arg1: i32) -> (i32, i32, i32) {
    %c0_i32 = arith.constant 0 : i32
    %c0_i32_0 = arith.constant 0 : i32
    return %arg0, %arg1, %c0_i32 : i32, i32, i32
  }
  func.func @transform_2(%arg0: i32, %arg1: i32) -> (i32, i32, i32) {
    %c0_i32 = arith.constant 0 : i32
    %c0_i32_0 = arith.constant 0 : i32
    return %arg0, %arg1, %c0_i32 : i32, i32, i32
  }
  func.func @transform_3(%arg0: i32, %arg1: i32) -> (i32, i32, i32) {
    %c0_i32 = arith.constant 0 : i32
    %c0_i32_0 = arith.constant 0 : i32
    return %arg0, %arg1, %c0_i32 : i32, i32, i32
  }
  func.func @transform_4(%arg0: i32, %arg1: i32) -> (i32, i32, i32) {
    %c0_i32 = arith.constant 0 : i32
    %c0_i32_0 = arith.constant 0 : i32
    %c0_i32_1 = arith.constant 0 : i32
    return %arg0, %c0_i32, %c0_i32_0 : i32, i32, i32
  }
}

</mosaic_0001>

<bundles_post_ra>
// kernel: tpu_custom_call.1
= control target key start
LH: loop header
LB: loop body
LE: loop exit
PB: predicated region body
PF: predicated region fallthrough
CT: control target
= control target key end

     0   :  { %s885_s0 = inlined_call_operand.vmem [shape: s32[2], index: 0, kind: input, shape index: {}]   ;;  %s886_s1 = inlined_call_operand.vmem [shape: f32[2,20,8], index: 1, kind: input, shape index: {}]   ;;  %s887_s2 = inlined_call_operand.vmem [shape: f32[2,20,8], index: 2, kind: input, shape index: {}]   ;;  %s888_s3 = inlined_call_operand.vmem [shape: f32[2,20,8], index: 3, kind: input, shape index: {}]   ;;  %s889_s4 = inlined_call_operand.hbm [shape: f32[2,8,128], index: 4, kind: output, shape index: {}]  }
   0x1   :  { %892 = sst [smem:[#allocation11_spill]] %s885_s0 }
   0x2   :  { %9 = vsyncpa [#allocation5], 0 }
   0x3   :  { %10 = vsyncpa [#allocation4], 0 }
   0x4   :  { %12 = vsyncpa [#allocation4 + $0x1], 0  ;;  %s722_s15 = smov 0   ;;  %s724_s16 = smov 0  }
   0x5   :  { %s726_s17 = smov 0   ;;  %s728_s18 = smov 0  }
   0x6   :  { %s730_s19 = smov 0   ;;  %s732_s20 = smov 0  }
   0x7   :  { %s734_s21 = smov 0   ;;  %s736_s22 = smov 0  }
   0x8 LB: > { %s477_s23 = sadd.s32 4294967295, %s692_s22   ;;  %s478_s24 = sadd.s32 4294967294, %s692_s22   ;;  %s692_s22 = sphi %s736_s22, %s18_s22   ;;  %s688_s21 = sphi %s734_s21, %s910_s21   ;;  %s684_s20 = sphi %s732_s20, %s909_s20   ;;  %s680_s19 = sphi %s730_s19, %s908_s19   ;;  %s676_s18 = sphi %s728_s18, %s907_s18   ;;  %s672_s17 = sphi %s726_s17, %s906_s17   ;;  %s668_s16 = sphi %s724_s16, %s905_s16   ;;  %s664_s15 = sphi %s722_s15, %s904_s15  }
   0x9   : > { %s27_s25 = sadd.s32 1, %s684_s20  ;;  %s30_s26 = sadd.s32 1, %s688_s21 }
   0xa   : > { %p28_p0 = scmp.ge.s32.totalorder %s27_s25, 3  ;;  %s142_s27 = sadd.s32 1, %s672_s17 }
   0xb   : > { %p152_p1 = scmp.ne.s32.totalorder %s672_s17, %s668_s16  ;;  %p153_p2 = scmp.eq.s32.totalorder %s477_s23, 5 }
   0xc   : > { %s912_s25 = smov (%p28_p0, %s27_s25), 0  ;;  %s914_s26 = smov (!%p28_p0, %s30_s26), %s688_s21 }
   0xd   : > { %893 = sst [smem:[#allocation9_spill]] %s912_s25  ;;  %p772_p3 = por %p153_p2, %p152_p1 }
   0xe   : > { %p158_p4 = scmp.ne.s32.totalorder %s668_s16, %s664_s15  ;;  %p32_p5 = scmp.ge.s32.totalorder %s914_s26, 2 }
   0xf   : > { %p159_p6 = scmp.eq.s32.totalorder %s478_s24, 5  ;;  %p479_p7 = scmp.ge.s32.totalorder %s692_s22, 1 }
  0x10   : > { %p166_p8 = scmp.lt.s32.totalorder %s692_s22, 7  ;;  %s916_s26 = smov (%p32_p5, %s914_s26), 0 }
  0x11   : > { %895 = sst [smem:[#allocation10_spill]] %s916_s26  ;;  %p782_p9 = por %p159_p6, %p158_p4 }
  0x12   : > { %p786_p10 = pnand %p479_p7, %p166_p8  ;;  %s139_s5 = ssub.s32 %s688_s21, %s916_s26 }
  0x13   : > { %s896_s29 = scalar_select %p782_p9, 1, 0 }
  0x14   : > { %p140_p11 = scmp.eq.s32.totalorder %s139_s5, 0  ;;  %p504_p12 = pneg %p786_p10 }
  0x15   : > { %p794_p13 = scmp.eq.s32.totalorder %s477_s23, 0  ;;  %s899_s0 = sld [smem:[#allocation11_spill]] }
  0x16   : > { %s802_s10 = scalar_select %p140_p11, %s672_s17, %s142_s27  }
  0x17   : > { %p505_p0 = pnand %p794_p13, %p504_p12 }
  0x19   : > { %p583_p2 = pneg %p505_p0 }
  0x1b   : > { %s179_s9 = sshll.u32 %s899_s0, 4  ;;  %s180_s9 = int_to_ptr.vmem [resolvable:$true] %s179_s9 }
  0x1c   : > { %s581_s11 = scalar_lea.vmem %s180_s9, 16  ;;  %p589_p6 = scmp.lt.s32.totalorder %s180_s9, %s180_s9 }
  0x1d   : > { %p582_p1 = scmp.ne.s32.totalorder %s180_s9, %s581_s11  ;;  %p590_p7 = scmp.lt.s32.totalorder %s581_s11, %s581_s11 }
  0x1f   : > { %p584_p4 = pnand %p583_p2, %p582_p1  ;;  %p591_p8 = por %p590_p7, %p589_p6 }
  0x21   : > { %p585_p5 = pneg %p584_p4 }
  0x23   : > { %p592_p9 = pnand %p591_p8, %p585_p5 }
  0x25   : > { %595 = shalt.err (!%p592_p9)
}
  0x26   : > { %s694_s12 = smov [#allocation3]   ;;  %225 = sbr.rel (%p786_p10) target bundleno = 307 (0x133), region = 36 }
  0x27   : > { %507 = dma.vmem_to_smem (!%p505_p0), %s180_s9, 16, %s694_s12, [#allocation5]  }
  0x2b   : > { %655 = dma.done.wait (%p794_p13), [#allocation5], 16  }
  0x2c   : > { %657 = vsyncadd (%p794_p13), [#allocation5], 4294967280 }
  0x2d   : > { %231 = sfence }
  0x2e   : > { %s891_s13 = sand.u32 1, %s668_s16   ;;  %p271_p9 = scmp.lt.s32.totalorder %s680_s19, 1 }
  0x2f   : > { %s816_s14 = sshll.u32 %s891_s13, 3  ;;  %p273_p10 = scmp.lt.s32.totalorder %s676_s18, 2 }
  0x30   : > { %s272_s23 = scalar_select %p271_p9, %s680_s19, 1 }
  0x31   : > { %s274_s24 = scalar_select %p273_p10, %s676_s18, 2 }
  0x32   : > { %s495_s27 = smul.u32 3, %s272_s23  ;;  %s270_s25 = scalar_lea.vmem [#allocation6], %s816_s14 }
  0x33   : > { %p488_p11 = scmp.ne.s32.totalorder %s676_s18, 0 }
  0x34   : > { %s276_s30 = sadd.s32 %s495_s27, %s274_s24 }
  0x35   : > { %s485_s5 = sshll.u32 %s276_s30, 3  ;;  %298 = sbr.rel (%p488_p11) target bundleno = 60 (0x3c), region = 44 }
  0x36   : > { %s278_s8 = scalar_lea.vmem %s886_s1, %s485_s5  ;;  %s286_s12 = scalar_lea.vmem %s887_s2, %s485_s5 }
  0x37   : > { %s294_s13 = scalar_lea.vmem %s888_s3, %s485_s5 }
  0x3a   : > { %vm299_vm0 = vcmask 64512   ;;  %v695_v0 = vmov 0.0  }
  0x3b   : > { %300 = vst.msk [vmem:[#allocation2] sm:$0xff] %vm299_vm0, %v695_v0 }
  0x3c PF: > { %s301_s23 = sld [smem:[#allocation3 + %s680_s19]]  ;;  %s489_s24 = sshll.u32 %s676_s18, 3  ;;  %v303_v1 = vlaneseq  ;;  %v307_v2 = vld [vmem:[%s294_s13] sm:$0xff]  ;;  %vm320_vm2 = vcmask 64512  }
  0x3d   : > { %v308_v3 = vld [vmem:[%s278_s8] sm:$0xff]  ;;  %v305_v5 = vstv %s489_s24  ;;  %p490_p12 = scmp.ne.s32.totalorder %s676_s18, 2 }
  0x3e   : > { %v310_v4 = vld [vmem:[%s286_s12] sm:$0xff]  ;;  %v309_v6 = vsub.f32 %v308_v3, %v307_v2  ;;  %v304_v8 = vshrl.u32 %v303_v1, 7 }
  0x3f   : > { %v311_v7 = vsub.f32 %v310_v4, %v307_v2 }
  0x40   : > { %v312_v9 = vmul.f32 %v309_v6, %v309_v6  ;;  %v306_v11 = vadd.s32 %v305_v5, %v304_v8 }
  0x41   : > { %v313_v10 = vmul.f32 %v311_v7, %v311_v7 }
  0x42   : > { %v315_v13 = vld [vmem:[#allocation2] sm:$0xff]  ;;  %v316_v14 = vstv %s301_s23 }
  0x43   : > { %v314_v12 = vadd.f32 %v313_v10, %v312_v9  ;;  %vm317_vm1 = vcmp.lt.s32.totalorder %v306_v11, %v316_v14 }
  0x44   : > { %325 = sbr.rel (%p490_p12) target bundleno = 283 (0x11b), region = 48 }
  0x45   : > { %v318_v15 = vsel %vm317_vm1, %v314_v12, 0.0 }
  0x46   : > { %v319_v16 = vadd.f32 %v318_v15, %v315_v13 }
  0x48   : > { %321 = vst.msk [vmem:[#allocation2] sm:$0xff] %vm320_vm2, %v319_v16 }
  0x4f   : > { %v326_v17 = vld [vmem:[#allocation2] sm:$0xff] }
  0x50   : > { %v327_v18 = vsel %vm320_vm2, %v326_v17, 0.0 }
  0x51   : > { %328 = vadd.xlane.f32.xlu0 %v327_v18 }
  0xda   : > { %v329_v19 = vpop.xlane.xlu0 %328 }
  0xdb   : > { %v330_v20 = vrot.slane %v329_v19, 4 }
  0xdd   : > { %v331_v21 = vadd.f32 %v330_v20, %v329_v19 }
  0xdf   : > { %v332_v22 = vrot.slane %v331_v21, 2 }
  0xe1   : > { %v333_v23 = vadd.f32 %v332_v22, %v331_v21 }
  0xe3   : > { %v334_v24 = vrot.slane %v333_v23, 1 }
  0xe5   : > { %v335_v25 = vadd.f32 %v334_v24, %v333_v23 }
  0xe7   : > { %496 = vpush %v335_v25 }
 0x118   : > { %s497_s0 = spop %496 }
 0x119   : > { %v337_v26 = vstv %s497_s0 }
 0x11a   : > { %338 = vst [vmem:[%s270_s25] sm:$0xff] %v337_v26 }
 0x11b PF: > { %s492_s18 = sshll.u32 %s680_s19, 7  ;;  %s353_s30 = sshll.u32 %s270_s25, 4  ;;  %s354_s30 = int_to_ptr.vmem [resolvable:$true] %s353_s30 }
 0x11c   : > { %s351_s27 = scalar_lea.hbm %s889_s4, %s492_s18  ;;  %s900_s5 = sand.u32 1, %s668_s16  }
 0x11d   : > { %s340_s6 = scalar_lea.sflag [#allocation4], %s900_s5  ;;  %s596_s7 = scalar_lea.vmem %s354_s30, 128 }
 0x11e   : > { %p597_p13 = scmp.ne.s32.totalorder %s354_s30, %s596_s7  ;;  %s696_s8 = smov [#allocation6]  }
 0x11f   : > { %s600_s9 = sshll.u32 %s696_s8, 4  ;;  %s601_s9 = int_to_ptr.vmem [resolvable:$false] %s600_s9 }
 0x120   : > { %p598_p0 = pnand %p597_p13, %p772_p3  ;;  %s602_s11 = scalar_lea.vmem %s601_s9, 256 }
 0x121   : > { %p603_p2 = scmp.lt.s32.totalorder %s354_s30, %s601_s9  ;;  %p604_p4 = scmp.lt.s32.totalorder %s602_s11, %s596_s7 }
 0x122   : > { %p599_p1 = pneg %p598_p0 }
 0x123   : > { %p605_p5 = por %p604_p4, %p603_p2 }
 0x125   : > { %p606_p6 = pnand %p605_p5, %p599_p1 }
 0x127   : > { %609 = shalt.err (!%p606_p6)
}
 0x128   : > { %s610_s19 = scalar_lea.hbm %s351_s27, 128  ;;  %s614_s12 = scalar_lea.hbm %s889_s4, 256 }
 0x129   : > { %p611_p7 = scmp.ne.s32.totalorder %s351_s27, %s610_s19  ;;  %p615_p10 = scmp.lt.s32.totalorder %s351_s27, %s889_s4 }
 0x12a   : > { %p616_p11 = scmp.lt.s32.totalorder %s614_s12, %s610_s19 }
 0x12b   : > { %p612_p8 = pnand %p611_p7, %p772_p3 }
 0x12c   : > { %p617_p12 = por %p616_p11, %p615_p10 }
 0x12d   : > { %p613_p9 = pneg %p612_p8 }
 0x12f   : > { %p618_p13 = pnand %p617_p12, %p613_p9 }
 0x131   : > { %621 = shalt.err (!%p618_p13)
}
 0x132   : > { %502 = dma.vmem_to_hbm [thread:$0]  (%p772_p3), %s354_s30, 128, %s351_s27, %s340_s6  }
 0x133 PF: > { %p514_p0 = scmp.ge.s32.totalorder %s692_s22, 2  ;;  %s365_s0 = sand.u32 1, %s664_s15  }
 0x134   : > { %p901_p1 = scmp.ne.s32.totalorder %s896_s29, 0  ;;  %s366_s18 = scalar_lea.sflag [#allocation4], %s365_s0 }
 0x136   : > { %p509_p2 = pnand %p514_p0, %p901_p1 }
 0x138   : > { %p510_p4 = pneg %p509_p2 }
 0x13a   : > { %659 = dma.done.wait (%p510_p4), %s366_s18, 128  }
 0x13b   : > { %661 = vsyncadd (%p510_p4), %s366_s18, 4294967168  ;;  %s18_s22 = sadd.s32 1, %s692_s22   ;;  %s902_s28 = sld [smem:[#allocation9_spill]] }
 0x13c   : > { %p15_p5 = scmp.ge.s32.totalorder %s18_s22, 8   ;;  %s903_s26 = sld [smem:[#allocation10_spill]] }
 0x13d   : > { %s904_s15 = smov %s668_s16  ;;  %s905_s16 = smov %s672_s17 }
 0x13e   : > { %s906_s17 = smov %s802_s10  ;;  %s907_s18 = smov %s684_s20 }
 0x13f   : > { %s908_s19 = smov %s688_s21  ;;  %17 = sbr.rel (!%p15_p5) target bundleno = 8 (0x8), region = 90 }
 0x141   : > { %s909_s20 = smov %s902_s28 }
 0x142   : > { %s910_s21 = smov %s903_s26 }
 0x144   :  { %371 = vsyncpa [#allocation4], 1 }
 0x145   :  { %373 = vsyncpa [#allocation4 + $0x1], 1 }
 0x146   :  { %374 = vsyncpa [#allocation5], 1 }
 0x147   :  { %376 = vsyncpa [#allocation5 + $0x1], 1 }

</bundles_post_ra>
